<compile_context>
chip_gen: v6e
topology: v6e:2x2x1
jax: 0.10.0
libtpu: 0.0.40
codegen_flags: <defaults>
</compile_context>

<pallas_src>
import functools
import math

import jax
import jax.numpy as jnp
from jax.experimental import pallas as pl
from jax.experimental.pallas import tpu as pltpu

_LN_EPS = 1e-5          # PyTorch LayerNorm default


def _layer_norm_f32(x, gamma, beta):
    mu = jnp.mean(x, axis=-1, keepdims=True)
    var = jnp.mean((x - mu) ** 2, axis=-1, keepdims=True)
    return (x - mu) * jax.lax.rsqrt(var + _LN_EPS) * gamma + beta


def _pick_ffn_tile(F):
    """Largest hidden K-chunk (<= 2048) that divides F; F itself if small."""
    if F <= 2048:
        return F
    for t in (2048, 1024, 512, 256, 128):
        if F % t == 0:
            return t
    return F


def _vmem_limit_bytes(S, D, F, tf):
    """Per-step block working set (double-buffered activations + resident
    weights + in-kernel temporaries) with headroom, capped < v7x 64 MiB."""
    act = 4 * (S * D * 4)                              # x in + out, 2 buffers
    wts = 2 * 2 * (D * 3 * D + D * D + 2 * D * F)      # bf16 weights, 2 buffers
    tmp = 4 * (S * 3 * D + S * tf + 4 * S * D)         # qkv / hidden / residual
    need = act + wts + tmp + (8 << 20)
    return int(min(max(need, 24 << 20), 48 << 20))


# ---------------------------------------------------------------------------
# fused layer kernel:  out = y + FFN(LN2(y)),  y = x + MHA(LN1(x))
# ---------------------------------------------------------------------------
def _layer_kernel(x_ref, g1_ref, b1_ref, wqkv_ref, bqkv_ref, wo_ref, bo_ref,
                  g2_ref, b2_ref, w1_ref, b1f_ref, w2_ref, b2f_ref, o_ref,
                  *, heads, scale, ffn_tile):
    S, D = x_ref.shape
    Dh = D // heads
    F = w1_ref.shape[1]

    x = x_ref[...]                                                   # (S,D) f32

    # ---------------- attention:  y = x + Wo @ concat_h(softmax(q k^T) v)
    xn = _layer_norm_f32(x, g1_ref[...], b1_ref[...]).astype(jnp.bfloat16)
    qkv = jnp.dot(xn, wqkv_ref[...],
                  preferred_element_type=jnp.float32) + bqkv_ref[...]  # (S,3D)

    # TODO(synk): for long sequences add a KV-block sweep with online (flash)
    # softmax so the per-head (S, S) score tile stays bounded in v7x VMEM.
    ctx = []
    for h in range(heads):
        q = qkv[:, h * Dh:(h + 1) * Dh].astype(jnp.bfloat16)
        k = qkv[:, D + h * Dh:D + (h + 1) * Dh].astype(jnp.bfloat16)
        v = qkv[:, 2 * D + h * Dh:2 * D + (h + 1) * Dh].astype(jnp.bfloat16)
        s = jax.lax.dot_general(q, k, (((1,), (1,)), ((), ())),
                                preferred_element_type=jnp.float32) * scale
        s = s - jnp.max(s, axis=-1, keepdims=True)
        p = jnp.exp(s)
        p = p / jnp.sum(p, axis=-1, keepdims=True)        # exact softmax
        ctx.append(jnp.dot(p.astype(jnp.bfloat16), v,
                           preferred_element_type=jnp.float32))       # (S,Dh)

    ctx = jnp.concatenate(ctx, axis=-1).astype(jnp.bfloat16)          # (S,D)
    y = x + jnp.dot(ctx, wo_ref[...],
                    preferred_element_type=jnp.float32) + bo_ref[...]

    # ---------------- feed-forward:  out = y + W2 @ relu(W1 @ LN2(y))
    yn = _layer_norm_f32(y, g2_ref[...], b2_ref[...]).astype(jnp.bfloat16)
    acc = jnp.zeros((S, D), jnp.float32)
    for c in range(F // ffn_tile):
        lo = c * ffn_tile
        hid = jnp.dot(yn, w1_ref[:, lo:lo + ffn_tile],
                      preferred_element_type=jnp.float32)
        hid = hid + b1f_ref[:, lo:lo + ffn_tile]
        hid = jnp.maximum(hid, 0.0).astype(jnp.bfloat16)
        acc = acc + jnp.dot(hid, w2_ref[lo:lo + ffn_tile, :],
                            preferred_element_type=jnp.float32)

    o_ref[...] = y + acc + b2f_ref[...]


def _layer_block(x, lp, heads):
    B, S, D = x.shape
    F = lp["w1"].shape[1]
    assert D % heads == 0, "dim must be divisible by heads"
    scale = 1.0 / math.sqrt(D // heads)
    ffn_tile = _pick_ffn_tile(F)

    batch_map = lambda b: (b, 0, 0)
    const2 = lambda b: (0, 0)

    in_specs = [
        pl.BlockSpec((None, S, D), batch_map),     # x (batch dim squeezed)
        pl.BlockSpec((1, D), const2),              # ln1 gamma
        pl.BlockSpec((1, D), const2),              # ln1 beta
        pl.BlockSpec((D, 3 * D), const2),          # fused Wqkv (bf16, resident)
        pl.BlockSpec((1, 3 * D), const2),          # fused bqkv
        pl.BlockSpec((D, D), const2),              # Wo (bf16, resident)
        pl.BlockSpec((1, D), const2),              # out-proj bias
        pl.BlockSpec((1, D), const2),              # ln2 gamma
        pl.BlockSpec((1, D), const2),              # ln2 beta
        pl.BlockSpec((D, F), const2),              # W1 (bf16, resident)
        pl.BlockSpec((1, F), const2),              # b1
        pl.BlockSpec((F, D), const2),              # W2 (bf16, resident)
        pl.BlockSpec((1, D), const2),              # b2
    ]
    args = (x, lp["g1"], lp["b1"], lp["wqkv"], lp["bqkv"], lp["wo"], lp["bo"],
            lp["g2"], lp["b2"], lp["w1"], lp["bf1"], lp["w2"], lp["bf2"])

    return pl.pallas_call(
        functools.partial(_layer_kernel, heads=heads, scale=scale,
                          ffn_tile=ffn_tile),
        grid=(B,),
        in_specs=in_specs,
        out_specs=pl.BlockSpec((None, S, D), batch_map),
        out_shape=jax.ShapeDtypeStruct((B, S, D), jnp.float32),
        input_output_aliases={0: 0},
        compiler_params=pltpu.CompilerParams(
            dimension_semantics=("parallel",),
            vmem_limit_bytes=_vmem_limit_bytes(S, D, F, ffn_tile)),
    )(*args)


# ---------------------------------------------------------------------------
# full transformer
# ---------------------------------------------------------------------------
@functools.partial(jax.jit, static_argnames="heads")
def transformer_forward(x_sbd, params, *, heads):
    """x_sbd: (S, B, D) like PyTorch nn.MultiheadAttention (batch_first=False)."""
    x = jnp.transpose(x_sbd, (1, 0, 2))            # single transpose in
    # TODO(synk): prefetch layer l+1 weights during layer l via cross-call
    # DMA futures (P10) to hide per-layer weight HBM traffic at small B*S.
    for lp in params:
        x = _layer_block(x, lp, heads)
    return jnp.transpose(x, (1, 0, 2))             # single transpose out


# ---------------------------------------------------------------------------
# parameters (PyTorch-native layout) + conversion to kernel layout
# ---------------------------------------------------------------------------
def init_torch_params(key, dim, depth, heads, mlp_dim):
    del heads
    params = []
    for layer in range(depth):
        k = jax.random.split(jax.random.fold_in(key, layer), 8)
        s = 0.05
        params.append(dict(
            ln1_g=jnp.ones((dim,), jnp.float32),
            ln1_b=jnp.zeros((dim,), jnp.float32),
            in_proj_w=s * jax.random.normal(k[0], (3 * dim, dim), jnp.float32),
            in_proj_b=s * jax.random.normal(k[1], (3 * dim,), jnp.float32),
            out_proj_w=s * jax.random.normal(k[2], (dim, dim), jnp.float32),
            out_proj_b=s * jax.random.normal(k[3], (dim,), jnp.float32),
            ln2_g=jnp.ones((dim,), jnp.float32),
            ln2_b=jnp.zeros((dim,), jnp.float32),
            fc1_w=s * jax.random.normal(k[4], (mlp_dim, dim), jnp.float32),
            fc1_b=s * jax.random.normal(k[5], (mlp_dim,), jnp.float32),
            fc2_w=s * jax.random.normal(k[6], (dim, mlp_dim), jnp.float32),
            fc2_b=s * jax.random.normal(k[7], (dim,), jnp.float32),
        ))
    return params


def prepare_params(torch_params):
    """PyTorch layout -> kernel layout (fused QKV, bf16 matmul weights)."""
    prepared = []
    for lp in torch_params:
        D = lp["ln1_g"].shape[0]
        F = lp["fc1_w"].shape[0]
        prepared.append(dict(
            g1=lp["ln1_g"].reshape(1, D), b1=lp["ln1_b"].reshape(1, D),
            wqkv=lp["in_proj_w"].T.astype(jnp.bfloat16),      # (D, 3D) cols [q|k|v]
            bqkv=lp["in_proj_b"].reshape(1, 3 * D),
            wo=lp["out_proj_w"].T.astype(jnp.bfloat16),       # (D, D)
            bo=lp["out_proj_b"].reshape(1, D),
            g2=lp["ln2_g"].reshape(1, D), b2=lp["ln2_b"].reshape(1, D),
            w1=lp["fc1_w"].T.astype(jnp.bfloat16),            # (D, F)
            bf1=lp["fc1_b"].reshape(1, F),
            w2=lp["fc2_w"].T.astype(jnp.bfloat16),            # (F, D)
            bf2=lp["fc2_b"].reshape(1, D),
        ))
    return prepared


def reference_forward(x_sbd, torch_params, heads):
    """Pure-JAX f32 reference matching the PyTorch module's math."""
    x = x_sbd
    S, B, D = x.shape
    Dh = D // heads

    def ln(y, g, b):
        mu = y.mean(-1, keepdims=True)
        var = ((y - mu) ** 2).mean(-1, keepdims=True)
        return (y - mu) / jnp.sqrt(var + _LN_EPS) * g + b

    for lp in torch_params:
        xn = ln(x, lp["ln1_g"], lp["ln1_b"])
        qkv = xn @ lp["in_proj_w"].T + lp["in_proj_b"]
        q, k, v = jnp.split(qkv, 3, axis=-1)
        to_h = lambda t: t.reshape(S, B, heads, Dh).transpose(1, 2, 0, 3)
        qh, kh, vh = to_h(q), to_h(k), to_h(v)
        s = jnp.einsum('bhqd,bhkd->bhqk', qh, kh) / math.sqrt(Dh)
        p = jax.nn.softmax(s, axis=-1)
        o = jnp.einsum('bhqk,bhkd->bhqd', p, vh)
        o = o.transpose(2, 0, 1, 3).reshape(S, B, D)
        x = x + o @ lp["out_proj_w"].T + lp["out_proj_b"]
        xn2 = ln(x, lp["ln2_g"], lp["ln2_b"])
        h1 = jax.nn.relu(xn2 @ lp["fc1_w"].T + lp["fc1_b"])
        x = x + h1 @ lp["fc2_w"].T + lp["fc2_b"]
    return x


if __name__ == "__main__":
    # Transformer(dim=32, depth=2, heads=4, mlp_dim=64); x: (seq=8, batch=2, dim=32)
    dim, depth, heads, mlp_dim = 32, 2, 4, 64
    seq, batch = 8, 2

    key = jax.random.PRNGKey(0)
    kx, kp = jax.random.split(key)
    x = jax.random.normal(kx, (seq, batch, dim), jnp.float32)

    torch_params = init_torch_params(kp, dim, depth, heads, mlp_dim)
    params = prepare_params(torch_params)

    out = transformer_forward(x, params, heads=heads)
    out = jax.block_until_ready(out)
    assert out.shape == (seq, batch, dim) and out.dtype == jnp.float32

    # consistency check vs a pure-JAX f32 reference (loose tol: bf16 matmuls)
    ref = reference_forward(x, torch_params, heads)
    max_err = float(jnp.max(jnp.abs(out - ref)))
    assert max_err < 5e-2, f"max abs error too large: {max_err}"

    print("KERNEL_OK")
</pallas_src>

<mosaic_0001>
module attributes {stable_mosaic.version = 11 : i64} {
  func.func @_layer_kernel(%arg0: i32, %arg1: memref<1x8x32xf32, #tpu.memory_space<vmem>>, %arg2: memref<1x32xf32, #tpu.memory_space<vmem>>, %arg3: memref<1x32xf32, #tpu.memory_space<vmem>>, %arg4: memref<32x96xbf16, #tpu.memory_space<vmem>>, %arg5: memref<1x96xf32, #tpu.memory_space<vmem>>, %arg6: memref<32x32xbf16, #tpu.memory_space<vmem>>, %arg7: memref<1x32xf32, #tpu.memory_space<vmem>>, %arg8: memref<1x32xf32, #tpu.memory_space<vmem>>, %arg9: memref<1x32xf32, #tpu.memory_space<vmem>>, %arg10: memref<32x64xbf16, #tpu.memory_space<vmem>>, %arg11: memref<1x64xf32, #tpu.memory_space<vmem>>, %arg12: memref<64x32xbf16, #tpu.memory_space<vmem>>, %arg13: memref<1x32xf32, #tpu.memory_space<vmem>>, %arg14: memref<1x8x32xf32, #tpu.memory_space<vmem>>) attributes {dimension_semantics = [#tpu.dimension_semantics<parallel>], iteration_bounds = array<i64: 2>, scalar_prefetch = 0 : i64, scratch_operands = 0 : i64, tpu.core_type = #tpu.core_type<tc>, window_params = [{transform_indices = @transform_0, window_bounds = array<i64: 1, 8, 32>}, {pipeline_mode = #tpu.pipeline_mode<synchronous>, transform_indices = @transform_1, window_bounds = array<i64: 1, 32>}, {pipeline_mode = #tpu.pipeline_mode<synchronous>, transform_indices = @transform_2, window_bounds = array<i64: 1, 32>}, {pipeline_mode = #tpu.pipeline_mode<synchronous>, transform_indices = @transform_3, window_bounds = array<i64: 32, 96>}, {pipeline_mode = #tpu.pipeline_mode<synchronous>, transform_indices = @transform_4, window_bounds = array<i64: 1, 96>}, {pipeline_mode = #tpu.pipeline_mode<synchronous>, transform_indices = @transform_5, window_bounds = array<i64: 32, 32>}, {pipeline_mode = #tpu.pipeline_mode<synchronous>, transform_indices = @transform_6, window_bounds = array<i64: 1, 32>}, {pipeline_mode = #tpu.pipeline_mode<synchronous>, transform_indices = @transform_7, window_bounds = array<i64: 1, 32>}, {pipeline_mode = #tpu.pipeline_mode<synchronous>, transform_indices = @transform_8, window_bounds = array<i64: 1, 32>}, {pipeline_mode = #tpu.pipeline_mode<synchronous>, transform_indices = @transform_9, window_bounds = array<i64: 32, 64>}, {pipeline_mode = #tpu.pipeline_mode<synchronous>, transform_indices = @transform_10, window_bounds = array<i64: 1, 64>}, {pipeline_mode = #tpu.pipeline_mode<synchronous>, transform_indices = @transform_11, window_bounds = array<i64: 64, 32>}, {pipeline_mode = #tpu.pipeline_mode<synchronous>, transform_indices = @transform_12, window_bounds = array<i64: 1, 32>}, {transform_indices = @transform_13, window_bounds = array<i64: 1, 8, 32>}]} {
    %c0 = arith.constant 0 : index
    %c0_0 = arith.constant 0 : index
    %c0_1 = arith.constant 0 : index
    %0 = vector.load %arg1[%c0, %c0_0, %c0_1] : memref<1x8x32xf32, #tpu.memory_space<vmem>>, vector<1x8x32xf32>
    %1 = vector.shape_cast %0 : vector<1x8x32xf32> to vector<8x32xf32>
    %c0_2 = arith.constant 0 : index
    %c0_3 = arith.constant 0 : index
    %2 = vector.load %arg2[%c0_2, %c0_3] : memref<1x32xf32, #tpu.memory_space<vmem>>, vector<1x32xf32>
    %c0_4 = arith.constant 0 : index
    %c0_5 = arith.constant 0 : index
    %3 = vector.load %arg3[%c0_4, %c0_5] : memref<1x32xf32, #tpu.memory_space<vmem>>, vector<1x32xf32>
    %cst = arith.constant dense<0.000000e+00> : vector<8xf32>
    %4 = vector.multi_reduction <add>, %1, %cst [1] : vector<8x32xf32> to vector<8xf32>
    %5 = vector.shape_cast %4 : vector<8xf32> to vector<8x1xf32>
    %cst_6 = arith.constant 3.200000e+01 : f32
    %6 = vector.broadcast %cst_6 : f32 to vector<8x1xf32>
    %7 = arith.divf %5, %6 : vector<8x1xf32>
    %8 = vector.broadcast %7 : vector<8x1xf32> to vector<8x32xf32>
    %9 = arith.subf %1, %8 : vector<8x32xf32>
    %10 = arith.mulf %9, %9 : vector<8x32xf32>
    %cst_7 = arith.constant dense<0.000000e+00> : vector<8xf32>
    %11 = vector.multi_reduction <add>, %10, %cst_7 [1] : vector<8x32xf32> to vector<8xf32>
    %12 = vector.shape_cast %11 : vector<8xf32> to vector<8x1xf32>
    %cst_8 = arith.constant 3.200000e+01 : f32
    %13 = vector.broadcast %cst_8 : f32 to vector<8x1xf32>
    %14 = arith.divf %12, %13 : vector<8x1xf32>
    %15 = vector.broadcast %7 : vector<8x1xf32> to vector<8x32xf32>
    %16 = arith.subf %1, %15 : vector<8x32xf32>
    %cst_9 = arith.constant 9.99999974E-6 : f32
    %17 = vector.broadcast %cst_9 : f32 to vector<8x1xf32>
    %18 = arith.addf %14, %17 : vector<8x1xf32>
    %19 = math.rsqrt %18 : vector<8x1xf32>
    %20 = vector.broadcast %19 : vector<8x1xf32> to vector<8x32xf32>
    %21 = arith.mulf %16, %20 : vector<8x32xf32>
    %22 = vector.broadcast %2 : vector<1x32xf32> to vector<8x32xf32>
    %23 = arith.mulf %21, %22 : vector<8x32xf32>
    %24 = vector.broadcast %3 : vector<1x32xf32> to vector<8x32xf32>
    %25 = arith.addf %23, %24 : vector<8x32xf32>
    %26 = arith.truncf %25 : vector<8x32xf32> to vector<8x32xbf16>
    %c0_10 = arith.constant 0 : index
    %c0_11 = arith.constant 0 : index
    %27 = vector.load %arg4[%c0_10, %c0_11] : memref<32x96xbf16, #tpu.memory_space<vmem>>, vector<32x96xbf16>
    %cst_12 = arith.constant dense<0.000000e+00> : vector<8x96xf32>
    %28 = tpu.matmul %26, %27, %cst_12 {dimension_numbers = #tpu.dot_dimension_numbers<[1], [0], [0], [1], [0, 0, 1, 1], [], []>} : vector<8x32xbf16>, vector<32x96xbf16>, vector<8x96xf32> -> vector<8x96xf32>
    %c0_13 = arith.constant 0 : index
    %c0_14 = arith.constant 0 : index
    %29 = vector.load %arg5[%c0_13, %c0_14] : memref<1x96xf32, #tpu.memory_space<vmem>>, vector<1x96xf32>
    %30 = vector.broadcast %29 : vector<1x96xf32> to vector<8x96xf32>
    %31 = arith.addf %28, %30 : vector<8x96xf32>
    %32 = vector.extract_strided_slice %31 {offsets = [0, 0], sizes = [8, 8], strides = [1, 1]} : vector<8x96xf32> to vector<8x8xf32>
    %33 = arith.truncf %32 : vector<8x8xf32> to vector<8x8xbf16>
    %34 = vector.extract_strided_slice %31 {offsets = [0, 32], sizes = [8, 8], strides = [1, 1]} : vector<8x96xf32> to vector<8x8xf32>
    %35 = arith.truncf %34 : vector<8x8xf32> to vector<8x8xbf16>
    %36 = vector.extract_strided_slice %31 {offsets = [0, 64], sizes = [8, 8], strides = [1, 1]} : vector<8x96xf32> to vector<8x8xf32>
    %37 = arith.truncf %36 : vector<8x8xf32> to vector<8x8xbf16>
    %cst_15 = arith.constant dense<0.000000e+00> : vector<8x8xf32>
    %38 = tpu.matmul %33, %35, %cst_15 {dimension_numbers = #tpu.dot_dimension_numbers<[1], [1], [0], [0], [0, 0, 1, 0], [], []>} : vector<8x8xbf16>, vector<8x8xbf16>, vector<8x8xf32> -> vector<8x8xf32>
    %cst_16 = arith.constant 0.353553385 : f32
    %39 = vector.broadcast %cst_16 : f32 to vector<8x8xf32>
    %40 = arith.mulf %38, %39 : vector<8x8xf32>
    %cst_17 = arith.constant dense<0xFF800000> : vector<8xf32>
    %41 = vector.multi_reduction <maximumf>, %40, %cst_17 [1] : vector<8x8xf32> to vector<8xf32>
    %42 = vector.shape_cast %41 : vector<8xf32> to vector<8x1xf32>
    %43 = vector.broadcast %42 : vector<8x1xf32> to vector<8x8xf32>
    %44 = arith.subf %40, %43 : vector<8x8xf32>
    %45 = math.exp %44 : vector<8x8xf32>
    %cst_18 = arith.constant dense<0.000000e+00> : vector<8xf32>
    %46 = vector.multi_reduction <add>, %45, %cst_18 [1] : vector<8x8xf32> to vector<8xf32>
    %47 = vector.shape_cast %46 : vector<8xf32> to vector<8x1xf32>
    %48 = vector.broadcast %47 : vector<8x1xf32> to vector<8x8xf32>
    %49 = arith.divf %45, %48 : vector<8x8xf32>
    %50 = arith.truncf %49 : vector<8x8xf32> to vector<8x8xbf16>
    %cst_19 = arith.constant dense<0.000000e+00> : vector<8x8xf32>
    %51 = tpu.matmul %50, %37, %cst_19 {dimension_numbers = #tpu.dot_dimension_numbers<[1], [0], [0], [1], [0, 0, 1, 1], [], []>} : vector<8x8xbf16>, vector<8x8xbf16>, vector<8x8xf32> -> vector<8x8xf32>
    %52 = vector.extract_strided_slice %31 {offsets = [0, 8], sizes = [8, 8], strides = [1, 1]} : vector<8x96xf32> to vector<8x8xf32>
    %53 = arith.truncf %52 : vector<8x8xf32> to vector<8x8xbf16>
    %54 = vector.extract_strided_slice %31 {offsets = [0, 40], sizes = [8, 8], strides = [1, 1]} : vector<8x96xf32> to vector<8x8xf32>
    %55 = arith.truncf %54 : vector<8x8xf32> to vector<8x8xbf16>
    %56 = vector.extract_strided_slice %31 {offsets = [0, 72], sizes = [8, 8], strides = [1, 1]} : vector<8x96xf32> to vector<8x8xf32>
    %57 = arith.truncf %56 : vector<8x8xf32> to vector<8x8xbf16>
    %cst_20 = arith.constant dense<0.000000e+00> : vector<8x8xf32>
    %58 = tpu.matmul %53, %55, %cst_20 {dimension_numbers = #tpu.dot_dimension_numbers<[1], [1], [0], [0], [0, 0, 1, 0], [], []>} : vector<8x8xbf16>, vector<8x8xbf16>, vector<8x8xf32> -> vector<8x8xf32>
    %cst_21 = arith.constant 0.353553385 : f32
    %59 = vector.broadcast %cst_21 : f32 to vector<8x8xf32>
    %60 = arith.mulf %58, %59 : vector<8x8xf32>
    %cst_22 = arith.constant dense<0xFF800000> : vector<8xf32>
    %61 = vector.multi_reduction <maximumf>, %60, %cst_22 [1] : vector<8x8xf32> to vector<8xf32>
    %62 = vector.shape_cast %61 : vector<8xf32> to vector<8x1xf32>
    %63 = vector.broadcast %62 : vector<8x1xf32> to vector<8x8xf32>
    %64 = arith.subf %60, %63 : vector<8x8xf32>
    %65 = math.exp %64 : vector<8x8xf32>
    %cst_23 = arith.constant dense<0.000000e+00> : vector<8xf32>
    %66 = vector.multi_reduction <add>, %65, %cst_23 [1] : vector<8x8xf32> to vector<8xf32>
    %67 = vector.shape_cast %66 : vector<8xf32> to vector<8x1xf32>
    %68 = vector.broadcast %67 : vector<8x1xf32> to vector<8x8xf32>
    %69 = arith.divf %65, %68 : vector<8x8xf32>
    %70 = arith.truncf %69 : vector<8x8xf32> to vector<8x8xbf16>
    %cst_24 = arith.constant dense<0.000000e+00> : vector<8x8xf32>
    %71 = tpu.matmul %70, %57, %cst_24 {dimension_numbers = #tpu.dot_dimension_numbers<[1], [0], [0], [1], [0, 0, 1, 1], [], []>} : vector<8x8xbf16>, vector<8x8xbf16>, vector<8x8xf32> -> vector<8x8xf32>
    %72 = vector.extract_strided_slice %31 {offsets = [0, 16], sizes = [8, 8], strides = [1, 1]} : vector<8x96xf32> to vector<8x8xf32>
    %73 = arith.truncf %72 : vector<8x8xf32> to vector<8x8xbf16>
    %74 = vector.extract_strided_slice %31 {offsets = [0, 48], sizes = [8, 8], strides = [1, 1]} : vector<8x96xf32> to vector<8x8xf32>
    %75 = arith.truncf %74 : vector<8x8xf32> to vector<8x8xbf16>
    %76 = vector.extract_strided_slice %31 {offsets = [0, 80], sizes = [8, 8], strides = [1, 1]} : vector<8x96xf32> to vector<8x8xf32>
    %77 = arith.truncf %76 : vector<8x8xf32> to vector<8x8xbf16>
    %cst_25 = arith.constant dense<0.000000e+00> : vector<8x8xf32>
    %78 = tpu.matmul %73, %75, %cst_25 {dimension_numbers = #tpu.dot_dimension_numbers<[1], [1], [0], [0], [0, 0, 1, 0], [], []>} : vector<8x8xbf16>, vector<8x8xbf16>, vector<8x8xf32> -> vector<8x8xf32>
    %cst_26 = arith.constant 0.353553385 : f32
    %79 = vector.broadcast %cst_26 : f32 to vector<8x8xf32>
    %80 = arith.mulf %78, %79 : vector<8x8xf32>
    %cst_27 = arith.constant dense<0xFF800000> : vector<8xf32>
    %81 = vector.multi_reduction <maximumf>, %80, %cst_27 [1] : vector<8x8xf32> to vector<8xf32>
    %82 = vector.shape_cast %81 : vector<8xf32> to vector<8x1xf32>
    %83 = vector.broadcast %82 : vector<8x1xf32> to vector<8x8xf32>
    %84 = arith.subf %80, %83 : vector<8x8xf32>
    %85 = math.exp %84 : vector<8x8xf32>
    %cst_28 = arith.constant dense<0.000000e+00> : vector<8xf32>
    %86 = vector.multi_reduction <add>, %85, %cst_28 [1] : vector<8x8xf32> to vector<8xf32>
    %87 = vector.shape_cast %86 : vector<8xf32> to vector<8x1xf32>
    %88 = vector.broadcast %87 : vector<8x1xf32> to vector<8x8xf32>
    %89 = arith.divf %85, %88 : vector<8x8xf32>
    %90 = arith.truncf %89 : vector<8x8xf32> to vector<8x8xbf16>
    %cst_29 = arith.constant dense<0.000000e+00> : vector<8x8xf32>
    %91 = tpu.matmul %90, %77, %cst_29 {dimension_numbers = #tpu.dot_dimension_numbers<[1], [0], [0], [1], [0, 0, 1, 1], [], []>} : vector<8x8xbf16>, vector<8x8xbf16>, vector<8x8xf32> -> vector<8x8xf32>
    %92 = vector.extract_strided_slice %31 {offsets = [0, 24], sizes = [8, 8], strides = [1, 1]} : vector<8x96xf32> to vector<8x8xf32>
    %93 = arith.truncf %92 : vector<8x8xf32> to vector<8x8xbf16>
    %94 = vector.extract_strided_slice %31 {offsets = [0, 56], sizes = [8, 8], strides = [1, 1]} : vector<8x96xf32> to vector<8x8xf32>
    %95 = arith.truncf %94 : vector<8x8xf32> to vector<8x8xbf16>
    %96 = vector.extract_strided_slice %31 {offsets = [0, 88], sizes = [8, 8], strides = [1, 1]} : vector<8x96xf32> to vector<8x8xf32>
    %97 = arith.truncf %96 : vector<8x8xf32> to vector<8x8xbf16>
    %cst_30 = arith.constant dense<0.000000e+00> : vector<8x8xf32>
    %98 = tpu.matmul %93, %95, %cst_30 {dimension_numbers = #tpu.dot_dimension_numbers<[1], [1], [0], [0], [0, 0, 1, 0], [], []>} : vector<8x8xbf16>, vector<8x8xbf16>, vector<8x8xf32> -> vector<8x8xf32>
    %cst_31 = arith.constant 0.353553385 : f32
    %99 = vector.broadcast %cst_31 : f32 to vector<8x8xf32>
    %100 = arith.mulf %98, %99 : vector<8x8xf32>
    %cst_32 = arith.constant dense<0xFF800000> : vector<8xf32>
    %101 = vector.multi_reduction <maximumf>, %100, %cst_32 [1] : vector<8x8xf32> to vector<8xf32>
    %102 = vector.shape_cast %101 : vector<8xf32> to vector<8x1xf32>
    %103 = vector.broadcast %102 : vector<8x1xf32> to vector<8x8xf32>
    %104 = arith.subf %100, %103 : vector<8x8xf32>
    %105 = math.exp %104 : vector<8x8xf32>
    %cst_33 = arith.constant dense<0.000000e+00> : vector<8xf32>
    %106 = vector.multi_reduction <add>, %105, %cst_33 [1] : vector<8x8xf32> to vector<8xf32>
    %107 = vector.shape_cast %106 : vector<8xf32> to vector<8x1xf32>
    %108 = vector.broadcast %107 : vector<8x1xf32> to vector<8x8xf32>
    %109 = arith.divf %105, %108 : vector<8x8xf32>
    %110 = arith.truncf %109 : vector<8x8xf32> to vector<8x8xbf16>
    %cst_34 = arith.constant dense<0.000000e+00> : vector<8x8xf32>
    %111 = tpu.matmul %110, %97, %cst_34 {dimension_numbers = #tpu.dot_dimension_numbers<[1], [0], [0], [1], [0, 0, 1, 1], [], []>} : vector<8x8xbf16>, vector<8x8xbf16>, vector<8x8xf32> -> vector<8x8xf32>
    %112 = tpu.concatenate %51, %71, %91, %111 in 1 : vector<8x8xf32>, vector<8x8xf32>, vector<8x8xf32>, vector<8x8xf32> -> vector<8x32xf32>
    %113 = arith.truncf %112 : vector<8x32xf32> to vector<8x32xbf16>
    %c0_35 = arith.constant 0 : index
    %c0_36 = arith.constant 0 : index
    %114 = vector.load %arg6[%c0_35, %c0_36] : memref<32x32xbf16, #tpu.memory_space<vmem>>, vector<32x32xbf16>
    %cst_37 = arith.constant dense<0.000000e+00> : vector<8x32xf32>
    %115 = tpu.matmul %113, %114, %cst_37 {dimension_numbers = #tpu.dot_dimension_numbers<[1], [0], [0], [1], [0, 0, 1, 1], [], []>} : vector<8x32xbf16>, vector<32x32xbf16>, vector<8x32xf32> -> vector<8x32xf32>
    %116 = arith.addf %1, %115 : vector<8x32xf32>
    %c0_38 = arith.constant 0 : index
    %c0_39 = arith.constant 0 : index
    %117 = vector.load %arg7[%c0_38, %c0_39] : memref<1x32xf32, #tpu.memory_space<vmem>>, vector<1x32xf32>
    %118 = vector.broadcast %117 : vector<1x32xf32> to vector<8x32xf32>
    %119 = arith.addf %116, %118 : vector<8x32xf32>
    %c0_40 = arith.constant 0 : index
    %c0_41 = arith.constant 0 : index
    %120 = vector.load %arg8[%c0_40, %c0_41] : memref<1x32xf32, #tpu.memory_space<vmem>>, vector<1x32xf32>
    %c0_42 = arith.constant 0 : index
    %c0_43 = arith.constant 0 : index
    %121 = vector.load %arg9[%c0_42, %c0_43] : memref<1x32xf32, #tpu.memory_space<vmem>>, vector<1x32xf32>
    %cst_44 = arith.constant dense<0.000000e+00> : vector<8xf32>
    %122 = vector.multi_reduction <add>, %119, %cst_44 [1] : vector<8x32xf32> to vector<8xf32>
    %123 = vector.shape_cast %122 : vector<8xf32> to vector<8x1xf32>
    %cst_45 = arith.constant 3.200000e+01 : f32
    %124 = vector.broadcast %cst_45 : f32 to vector<8x1xf32>
    %125 = arith.divf %123, %124 : vector<8x1xf32>
    %126 = vector.broadcast %125 : vector<8x1xf32> to vector<8x32xf32>
    %127 = arith.subf %119, %126 : vector<8x32xf32>
    %128 = arith.mulf %127, %127 : vector<8x32xf32>
    %cst_46 = arith.constant dense<0.000000e+00> : vector<8xf32>
    %129 = vector.multi_reduction <add>, %128, %cst_46 [1] : vector<8x32xf32> to vector<8xf32>
    %130 = vector.shape_cast %129 : vector<8xf32> to vector<8x1xf32>
    %cst_47 = arith.constant 3.200000e+01 : f32
    %131 = vector.broadcast %cst_47 : f32 to vector<8x1xf32>
    %132 = arith.divf %130, %131 : vector<8x1xf32>
    %133 = vector.broadcast %125 : vector<8x1xf32> to vector<8x32xf32>
    %134 = arith.subf %119, %133 : vector<8x32xf32>
    %cst_48 = arith.constant 9.99999974E-6 : f32
    %135 = vector.broadcast %cst_48 : f32 to vector<8x1xf32>
    %136 = arith.addf %132, %135 : vector<8x1xf32>
    %137 = math.rsqrt %136 : vector<8x1xf32>
    %138 = vector.broadcast %137 : vector<8x1xf32> to vector<8x32xf32>
    %139 = arith.mulf %134, %138 : vector<8x32xf32>
    %140 = vector.broadcast %120 : vector<1x32xf32> to vector<8x32xf32>
    %141 = arith.mulf %139, %140 : vector<8x32xf32>
    %142 = vector.broadcast %121 : vector<1x32xf32> to vector<8x32xf32>
    %143 = arith.addf %141, %142 : vector<8x32xf32>
    %144 = arith.truncf %143 : vector<8x32xf32> to vector<8x32xbf16>
    %cst_49 = arith.constant 0.000000e+00 : f32
    %145 = vector.broadcast %cst_49 : f32 to vector<8x32xf32>
    %c0_50 = arith.constant 0 : index
    %c0_51 = arith.constant 0 : index
    %146 = vector.load %arg10[%c0_50, %c0_51] : memref<32x64xbf16, #tpu.memory_space<vmem>>, vector<32x64xbf16>
    %cst_52 = arith.constant dense<0.000000e+00> : vector<8x64xf32>
    %147 = tpu.matmul %144, %146, %cst_52 {dimension_numbers = #tpu.dot_dimension_numbers<[1], [0], [0], [1], [0, 0, 1, 1], [], []>} : vector<8x32xbf16>, vector<32x64xbf16>, vector<8x64xf32> -> vector<8x64xf32>
    %c0_53 = arith.constant 0 : index
    %c0_54 = arith.constant 0 : index
    %148 = vector.load %arg11[%c0_53, %c0_54] : memref<1x64xf32, #tpu.memory_space<vmem>>, vector<1x64xf32>
    %149 = vector.broadcast %148 : vector<1x64xf32> to vector<8x64xf32>
    %150 = arith.addf %147, %149 : vector<8x64xf32>
    %cst_55 = arith.constant 0.000000e+00 : f32
    %151 = vector.broadcast %cst_55 : f32 to vector<8x64xf32>
    %152 = arith.maximumf %150, %151 : vector<8x64xf32>
    %153 = arith.truncf %152 : vector<8x64xf32> to vector<8x64xbf16>
    %c0_56 = arith.constant 0 : index
    %c0_57 = arith.constant 0 : index
    %154 = vector.load %arg12[%c0_56, %c0_57] : memref<64x32xbf16, #tpu.memory_space<vmem>>, vector<64x32xbf16>
    %cst_58 = arith.constant dense<0.000000e+00> : vector<8x32xf32>
    %155 = tpu.matmul %153, %154, %cst_58 {dimension_numbers = #tpu.dot_dimension_numbers<[1], [0], [0], [1], [0, 0, 1, 1], [], []>} : vector<8x64xbf16>, vector<64x32xbf16>, vector<8x32xf32> -> vector<8x32xf32>
    %156 = arith.addf %145, %155 : vector<8x32xf32>
    %157 = arith.addf %119, %156 : vector<8x32xf32>
    %c0_59 = arith.constant 0 : index
    %c0_60 = arith.constant 0 : index
    %158 = vector.load %arg13[%c0_59, %c0_60] : memref<1x32xf32, #tpu.memory_space<vmem>>, vector<1x32xf32>
    %159 = vector.broadcast %158 : vector<1x32xf32> to vector<8x32xf32>
    %160 = arith.addf %157, %159 : vector<8x32xf32>
    %c0_61 = arith.constant 0 : index
    %c0_62 = arith.constant 0 : index
    %c0_63 = arith.constant 0 : index
    %161 = vector.load %arg14[%c0_61, %c0_62, %c0_63] : memref<1x8x32xf32, #tpu.memory_space<vmem>>, vector<1x8x32xf32>
    %162 = vector.shape_cast %161 : vector<1x8x32xf32> to vector<8x32xf32>
    %163 = vector.shape_cast %160 : vector<8x32xf32> to vector<1x8x32xf32>
    tpu.vector_store %arg14[%c0_61, %c0_62, %c0_63], %163 {strides = array<i32>} : memref<1x8x32xf32, #tpu.memory_space<vmem>>, vector<1x8x32xf32>,
    return
  }
  func.func @transform_0(%arg0: i32) -> (i32, i32, i32) {
    %c0_i32 = arith.constant 0 : i32
    %c0_i32_0 = arith.constant 0 : i32
    %c0_i32_1 = arith.constant 0 : i32
    return %arg0, %c0_i32, %c0_i32_0 : i32, i32, i32
  }
  func.func @transform_1(%arg0: i32) -> (i32, i32) {
    %c0_i32 = arith.constant 0 : i32
    %c0_i32_0 = arith.constant 0 : i32
    %c0_i32_1 = arith.constant 0 : i32
    return %c0_i32, %c0_i32_0 : i32, i32
  }
  func.func @transform_2(%arg0: i32) -> (i32, i32) {
    %c0_i32 = arith.constant 0 : i32
    %c0_i32_0 = arith.constant 0 : i32
    %c0_i32_1 = arith.constant 0 : i32
    return %c0_i32, %c0_i32_0 : i32, i32
  }
  func.func @transform_3(%arg0: i32) -> (i32, i32) {
    %c0_i32 = arith.constant 0 : i32
    %c0_i32_0 = arith.constant 0 : i32
    %c0_i32_1 = arith.constant 0 : i32
    return %c0_i32, %c0_i32_0 : i32, i32
  }
  func.func @transform_4(%arg0: i32) -> (i32, i32) {
    %c0_i32 = arith.constant 0 : i32
    %c0_i32_0 = arith.constant 0 : i32
    %c0_i32_1 = arith.constant 0 : i32
    return %c0_i32, %c0_i32_0 : i32, i32
  }
  func.func @transform_5(%arg0: i32) -> (i32, i32) {
    %c0_i32 = arith.constant 0 : i32
    %c0_i32_0 = arith.constant 0 : i32
    %c0_i32_1 = arith.constant 0 : i32
    return %c0_i32, %c0_i32_0 : i32, i32
  }
  func.func @transform_6(%arg0: i32) -> (i32, i32) {
    %c0_i32 = arith.constant 0 : i32
    %c0_i32_0 = arith.constant 0 : i32
    %c0_i32_1 = arith.constant 0 : i32
    return %c0_i32, %c0_i32_0 : i32, i32
  }
  func.func @transform_7(%arg0: i32) -> (i32, i32) {
    %c0_i32 = arith.constant 0 : i32
    %c0_i32_0 = arith.constant 0 : i32
    %c0_i32_1 = arith.constant 0 : i32
    return %c0_i32, %c0_i32_0 : i32, i32
  }
  func.func @transform_8(%arg0: i32) -> (i32, i32) {
    %c0_i32 = arith.constant 0 : i32
    %c0_i32_0 = arith.constant 0 : i32
    %c0_i32_1 = arith.constant 0 : i32
    return %c0_i32, %c0_i32_0 : i32, i32
  }
  func.func @transform_9(%arg0: i32) -> (i32, i32) {
    %c0_i32 = arith.constant 0 : i32
    %c0_i32_0 = arith.constant 0 : i32
    %c0_i32_1 = arith.constant 0 : i32
    return %c0_i32, %c0_i32_0 : i32, i32
  }
  func.func @transform_10(%arg0: i32) -> (i32, i32) {
    %c0_i32 = arith.constant 0 : i32
    %c0_i32_0 = arith.constant 0 : i32
    %c0_i32_1 = arith.constant 0 : i32
    return %c0_i32, %c0_i32_0 : i32, i32
  }
  func.func @transform_11(%arg0: i32) -> (i32, i32) {
    %c0_i32 = arith.constant 0 : i32
    %c0_i32_0 = arith.constant 0 : i32
    %c0_i32_1 = arith.constant 0 : i32
    return %c0_i32, %c0_i32_0 : i32, i32
  }
  func.func @transform_12(%arg0: i32) -> (i32, i32) {
    %c0_i32 = arith.constant 0 : i32
    %c0_i32_0 = arith.constant 0 : i32
    %c0_i32_1 = arith.constant 0 : i32
    return %c0_i32, %c0_i32_0 : i32, i32
  }
  func.func @transform_13(%arg0: i32) -> (i32, i32, i32) {
    %c0_i32 = arith.constant 0 : i32
    %c0_i32_0 = arith.constant 0 : i32
    %c0_i32_1 = arith.constant 0 : i32
    return %arg0, %c0_i32, %c0_i32_0 : i32, i32, i32
  }
}

</mosaic_0001>

<bundles_post_ra>
// kernel: transformer_forward.2
= control target key start
LH: loop header
LB: loop body
LE: loop exit
PB: predicated region body
PF: predicated region fallthrough
CT: control target
= control target key end

     0   :  { %s1606_s25 = smov 0   ;;  %s1778_s0 = inlined_call_operand.vmem [shape: f32[2,8,32], index: 0, kind: input, shape index: {}, may-alias: {0,13}]   ;;  %s1779_s1 = inlined_call_operand.vmem [shape: f32[1,32], index: 1, kind: input, shape index: {}]   ;;  %s1780_s2 = inlined_call_operand.vmem [shape: f32[1,32], index: 2, kind: input, shape index: {}]   ;;  %s1781_s3 = inlined_call_operand.vmem [shape: bf16[32,96], index: 3, kind: input, shape index: {}]   ;;  %s1782_s4 = inlined_call_operand.vmem [shape: f32[1,96], index: 4, kind: input, shape index: {}]   ;;  %s1783_s5 = inlined_call_operand.vmem [shape: bf16[32,32], index: 5, kind: input, shape index: {}]   ;;  %s1784_s6 = inlined_call_operand.vmem [shape: f32[1,32], index: 6, kind: input, shape index: {}]   ;;  %s1785_s7 = inlined_call_operand.vmem [shape: f32[1,32], index: 7, kind: input, shape index: {}]   ;;  %s1786_s8 = inlined_call_operand.vmem [shape: f32[1,32], index: 8, kind: input, shape index: {}]   ;;  %s1787_s9 = inlined_call_operand.vmem [shape: bf16[32,64], index: 9, kind: input, shape index: {}]   ;;  %s1788_s10 = inlined_call_operand.vmem [shape: f32[1,64], index: 10, kind: input, shape index: {}]   ;;  %s1789_s11 = inlined_call_operand.vmem [shape: bf16[64,32], index: 11, kind: input, shape index: {}]   ;;  %s1790_s12 = inlined_call_operand.vmem [shape: f32[1,32], index: 12, kind: input, shape index: {}]   ;;  %s1791_s13 = inlined_call_operand.vmem [shape: f32[2,8,32], index: 13, kind: output, shape index: {}, may-alias: {0,13}]  }
   0x1 LB: > { %s1305_s26 = sadd.s32 4294967295, %s1518_s25   ;;  %p1309_p0 = scmp.ge.s32.totalorder %s1518_s25, 1  ;;  %s1518_s25 = sphi %s1606_s25, %s23_s25  }
   0x2   : > { %p386_p1 = scmp.lt.s32.totalorder %s1518_s25, 3 }
   0x4   : > { %p387_p2 = pnand %p1309_p0, %p386_p1 }
   0x5   : > { %p428_p3 = scmp.lt.s32.totalorder (!%p387_p2), %s1305_s26, 1  ;;  %s1522_s24 = smov (!%p387_p2), 120  }
   0x6   : > { %390 = sbr.rel (%p387_p2) target bundleno = 2431 (0x97f), region = 72  ;;  %s1523_s28 = smov (!%p387_p2), 96  }
   0x7   : > { %s1524_s29 = smov (!%p387_p2), 88   ;;  %s1526_s14 = smov (!%p387_p2), 112  }
   0x8   : > { %s1527_s15 = smov (!%p387_p2), 72   ;;  %s1528_s16 = smov (!%p387_p2), 104  }
   0x9   : > { %s1529_s17 = smov (!%p387_p2), 64   ;;  %s1530_s18 = smov (!%p387_p2), 56  }
   0xa   : > { %s1531_s19 = smov (!%p387_p2), 48   ;;  %s1532_s20 = smov (!%p387_p2), 40  }
   0xb   : > { %s1793_s26 = smov (!%p428_p3, %s1305_s26), 1  ;;  %vm440_vm0 = vcmask 261120   ;;  %v1482_v7 = vld [vmem:[%s1781_s3 + $0x8] sm:$0xff]   ;;  %v1520_v8 = vmov 0.0   ;;  %vm1521_vm1 = vmmov 0   ;;  %v1483_v9 = vld [vmem:[%s1781_s3] sm:$0xff]  }
   0xc   : > { %s1310_s27 = sshll.u32 %s1793_s26, 3  ;;  %1374 = vmatprep.subr.bf16.mxu0 %v1520_v8  ;;  %1378 = vmatprep.mubr.msk.bf16.mxu0 %vm1521_vm1, %v1520_v8  ;;  %v1312_v14 = vld [vmem:[%s1779_s1] ss:$0 sm:$0xff]  ;;  %vm540_vm2 = vcmask 64512   ;;  %vm605_vm3 = vcmask 1043456   ;;  %s1533_s21 = smov 8  }
   0xd   : > { %s431_s30 = scalar_lea.vmem %s1778_s0, %s1310_s27  ;;  %1375 = vmatpush3.bf16.msra.mxu0 %v1482_v7  ;;  %1382 = vmatprep.subr.bf16.mxu1 %v1520_v8  ;;  %v1313_v16 = vld [vmem:[%s1780_s2] ss:$0 sm:$0xff]  ;;  %vm995_vm4 = vcmask 130048   ;;  %vm997_vm5 = vcmask 195584   ;;  %vm1198_vm6 = vcmask 523264  }
   0xe   : > { %v1622_v0 = vld [vmem:[%s431_s30] sm:$0xff]  ;;  %1376 = vmatprep.subr.bf16.mxu0 %v1520_v8  ;;  %1384 = vmatprep.mubr.msk.bf16.mxu1 %vm1521_vm1, %v1520_v8  ;;  %s1525_s30 = smov 80  }
   0xf   : > { %v441_v1 = vsel %vm440_vm0, %v1622_v0, 0.0  ;;  %v1314_v20 = vld [vmem:[%s1782_s4] ss:$0 sm:$0xff] }
  0x10   : > { %442 = vadd.xlane.f32.xlu0 %v441_v1 }
  0x11   : > { %1377 = vmatpush3.bf16.msra.mxu0 %v1483_v9 }
  0x12   : > { %1388 = vmatprep.subr.bf16.mxu0 %v1520_v8 }
  0x99   : > { %v443_v2 = vpop.xlane.xlu0 %442 }
  0x9a   : > { %v445_v3 = vmul.f32 0.03125, %v443_v2 }
  0x9c   : > { %v446_v4 = vsub.f32 %v1622_v0, %v445_v3 }
  0x9e   : > { %v447_v5 = vmul.f32 %v446_v4, %v446_v4 }
  0xa0   : > { %v448_v6 = vsel %vm440_vm0, %v447_v5, 0.0 }
  0xa1   : > { %449 = vadd.xlane.f32.xlu0 %v448_v6 }
 0x12a   : > { %v450_v10 = vpop.xlane.xlu0 %449 }
 0x12b   : > { %v451_v11 = vmul.f32 0.03125, %v450_v10 }
 0x12d   : > { %v452_v12 = vadd.f32 1e-05, %v451_v11 }
 0x12f   : > { %1492 = vrsqrt.f32 %v452_v12 }
 0x13c   : > { %v1493_v13 = vpop.eup %1492 }
 0x13d   : > { %v454_v15 = vmul.f32 %v1493_v13, %v446_v4 }
 0x13f   : > { %v461_v17 = vmul.f32 %v1312_v14, %v454_v15 }
 0x141   : > { %v468_v18 = vadd.f32 %v1313_v16, %v461_v17 }
 0x143   : > { %v469_v19 = vpack.c.bf16 %v468_v18, %v468_v18 }
 0x145   : > { %1379 = vmatmul.mubr.msk.bf16.vlgmr.msra.gmra.mxu0 %vm440_vm0, %v469_v19 }
 0x146   : > { %1390 = vmatprep.mubr.msk.bf16.mxu0 %vm1521_vm1, %v1520_v8 }
 0x205   : > { %v530_v21 = vpop.f32.mrf.mxu0 }
 0x206   : > { %v531_v22 = vadd.f32 %v1314_v20, %v530_v21 }
 0x207   : > { %v1380_v23 = vpop.f32.mrf.mxu0 }
 0x208   : > { %v1654_v24 = vpack.c.bf16 %v531_v22, %v531_v22 }
 0x209   : > { %v533_v25 = vpop.f32.mrf.mxu0 }
 0x20a   : > { %649 = vrot.lane.b32.xlu0 %v1654_v24, %s1522_s24  ;;  %538 = vrot.lane.b32.xlu1 %v1654_v24, %s1523_s28  ;;  %s435_s24 = scalar_lea.vmem %s1791_s13, %s1310_s27 }
 0x20b   : > { %v1381_v26 = vpop.f32.mrf.mxu0 }
 0x20e   : > { %651 = vrot.lane.b32.xlu1 %v1654_v24, %s1524_s29  ;;  %s1534_s29 = smov 16  }
 0x212   : > { %762 = vrot.lane.b32.xlu1 %v1654_v24, %s1525_s30  ;;  %s1535_s30 = smov 24  }
 0x216   : > { %760 = vrot.lane.b32.xlu1 %v1654_v24, %s1526_s14 }
 0x21a   : > { %873 = vrot.lane.b32.xlu1 %v1654_v24, %s1527_s15 }
 0x21e   : > { %871 = vrot.lane.b32.xlu1 %v1654_v24, %s1528_s16 }
 0x27c   : > { %v539_v27 = vpop.permute.xlu1 %538  ;;  %v650_v32 = vpop.permute.xlu0 %649 }
 0x27d   : > { %v545_v28 = vsel %vm540_vm2, %v539_v27, 0 }
 0x27e   : > { %1383 = vmatpush3.bf16.xpose.msra.mxu1 %v545_v28 }
 0x27f   : > { %1394 = vmatprep.subr.bf16.mxu1 %v1520_v8 }
 0x280   : > { %v652_v29 = vpop.permute.xlu1 %651 }
 0x281   : > { %v657_v30 = vsel %vm540_vm2, %v652_v29, 0 }
 0x284   : > { %v763_v31 = vpop.permute.xlu1 %762 }
 0x285   : > { %1385 = vmatmul.mubr.msk.bf16.vlgmr.msra.gmra.mxu1 %vm540_vm2, %v1654_v24  ;;  %v768_v34 = vsel %vm540_vm2, %v763_v31, 0 }
 0x286   : > { %1395 = vmatpush3.bf16.xpose.msra.mxu1 %v657_v30  ;;  %1396 = vmatprep.mubr.msk.bf16.mxu1 %vm1521_vm1, %v1520_v8 }
 0x287   : > { %1406 = vmatprep.subr.bf16.mxu1 %v1520_v8 }
 0x288   : > { %v761_v33 = vpop.permute.xlu1 %760 }
 0x28c   : > { %v874_v35 = vpop.permute.xlu1 %873 }
 0x28d   : > { %1397 = vmatmul.mubr.msk.bf16.vlgmr.msra.gmra.mxu1 %vm540_vm2, %v650_v32  ;;  %v879_v36 = vsel %vm540_vm2, %v874_v35, 0 }
 0x28e   : > { %1407 = vmatpush3.bf16.xpose.msra.mxu1 %v768_v34  ;;  %1408 = vmatprep.mubr.msk.bf16.mxu1 %vm1521_vm1, %v1520_v8 }
 0x28f   : > { %1418 = vmatprep.subr.bf16.mxu1 %v1520_v8 }
 0x290   : > { %v872_v37 = vpop.permute.xlu1 %871 }
 0x295   : > { %1409 = vmatmul.mubr.msk.bf16.vlgmr.msra.gmra.mxu1 %vm540_vm2, %v761_v33 }
 0x296   : > { %1419 = vmatpush3.bf16.xpose.msra.mxu1 %v879_v36  ;;  %1420 = vmatprep.mubr.msk.bf16.mxu1 %vm1521_vm1, %v1520_v8 }
 0x297   : > { %1430 = vmatprep.subr.bf16.mxu1 %v1520_v8 }
 0x29d   : > { %1421 = vmatmul.mubr.msk.bf16.vlgmr.msra.gmra.mxu1 %vm540_vm2, %v872_v37 }
 0x29e   : > { %1434 = vmatprep.mubr.msk.bf16.mxu1 %vm1521_vm1, %v1520_v8 }
 0x345   : > { %v581_v38 = vpop.f32.mrf.mxu1 }
 0x346   : > { %v587_v39 = vmul.f32 0.35355338, %v581_v38 }
 0x347   : > { %v1386_v40 = vpop.f32.mrf.mxu1 }
 0x348   : > { %v588_v41 = vsel %vm540_vm2, %v587_v39, -inf }
 0x349   : > { %589 = vmax.xlane.f32.xlu1 %v588_v41  ;;  %v584_v42 = vpop.f32.mrf.mxu1 }
 0x34b   : > { %v1387_v43 = vpop.f32.mrf.mxu1 }
 0x34d   : > { %v693_v44 = vpop.f32.mrf.mxu1 }
 0x34e   : > { %v699_v45 = vmul.f32 0.35355338, %v693_v44 }
 0x34f   : > { %v1398_v46 = vpop.f32.mrf.mxu1 }
 0x350   : > { %v700_v47 = vsel %vm540_vm2, %v699_v45, -inf }
 0x351   : > { %701 = vmax.xlane.f32.xlu0 %v700_v47  ;;  %v696_v48 = vpop.f32.mrf.mxu1 }
 0x353   : > { %v1399_v49 = vpop.f32.mrf.mxu1 }
 0x355   : > { %v804_v50 = vpop.f32.mrf.mxu1 }
 0x356   : > { %v810_v51 = vmul.f32 0.35355338, %v804_v50 }
 0x357   : > { %v1410_v52 = vpop.f32.mrf.mxu1 }
 0x358   : > { %v811_v53 = vsel %vm540_vm2, %v810_v51, -inf  ;;  %v1484_v52 = vld [vmem:[%s1783_s5 + $0x8] sm:$0xff]  }
 0x359   : > { %812 = vmax.xlane.f32.xlu1 %v811_v53  ;;  %v807_v54 = vpop.f32.mrf.mxu1  ;;  %1431 = vmatpush3.bf16.msra.mxu1 %v1484_v52  ;;  %v1485_v53 = vld [vmem:[%s1783_s5] sm:$0xff]  }
 0x35a   : > { %1432 = vmatprep.subr.bf16.mxu1 %v1520_v8 }
 0x35b   : > { %v1411_v55 = vpop.f32.mrf.mxu1 }
 0x35d   : > { %v915_v56 = vpop.f32.mrf.mxu1  ;;  %1433 = vmatpush3.bf16.msra.mxu1 %v1485_v53 }
 0x35e   : > { %v921_v57 = vmul.f32 0.35355338, %v915_v56  ;;  %1446 = vmatprep.subr.bf16.mxu1 %v1520_v8 }
 0x35f   : > { %v1422_v58 = vpop.f32.mrf.mxu1 }
 0x360   : > { %v922_v59 = vsel %vm540_vm2, %v921_v57, -inf }
 0x361   : > { %923 = vmax.xlane.f32.xlu0 %v922_v59  ;;  %v918_v60 = vpop.f32.mrf.mxu1 }
 0x363   : > { %v1423_v61 = vpop.f32.mrf.mxu1 }
 0x3d2   : > { %v590_v62 = vpop.xlane.xlu1 %589 }
 0x3d3   : > { %v591_v63 = vsub.f32 %v587_v39, %v590_v62 }
 0x3d5   : > { %v592_v1 = vmul.f32 1.442695, %v591_v63 }
 0x3d7   : > { %1494 = vpow2.f32 %v592_v1 }
 0x3da   : > { %v702_v2 = vpop.xlane.xlu0 %701 }
 0x3db   : > { %v703_v3 = vsub.f32 %v699_v45, %v702_v2 }
 0x3dd   : > { %v704_v4 = vmul.f32 1.442695, %v703_v3 }
 0x3df   : > { %1496 = vpow2.f32 %v704_v4 }
 0x3e2   : > { %v813_v15 = vpop.xlane.xlu1 %812 }
 0x3e3   : > { %v814_v16 = vsub.f32 %v810_v51, %v813_v15 }
 0x3e4   : > { %v1495_v5 = vpop.eup %1494 }
 0x3e5   : > { %v594_v6 = vsel %vm540_vm2, %v1495_v5, 0.0  ;;  %v815_v17 = vmul.f32 1.442695, %v814_v16 }
 0x3e6   : > { %595 = vadd.xlane.f32.xlu1 %v594_v6 }
 0x3ea   : > { %v924_v7 = vpop.xlane.xlu0 %923 }
 0x3eb   : > { %v925_v9 = vsub.f32 %v921_v57, %v924_v7  ;;  %v1329_v7 = vld [vmem:[%s1784_s6] ss:$0 sm:$0xff] }
 0x3ec   : > { %v1497_v10 = vpop.eup %1496 }
 0x3ed   : > { %v926_v11 = vmul.f32 1.442695, %v925_v9  ;;  %v706_v12 = vsel %vm540_vm2, %v1497_v10, 0.0 }
 0x3ee   : > { %707 = vadd.xlane.f32.xlu0 %v706_v12 }
 0x3ef   : > { %1498 = vpow2.f32 %v926_v11 }
 0x3f0   : > { %1500 = vpow2.f32 %v815_v17 }
 0x3f7   : > { %600 = vrot.lane.b32.xlu1 %v1654_v24, %s1529_s17 }
 0x3fc   : > { %v1499_v13 = vpop.eup %1498 }
 0x3fd   : > { %v928_v14 = vsel %vm540_vm2, %v1499_v13, 0.0  ;;  %v1501_v18 = vpop.eup %1500 }
 0x3fe   : > { %929 = vadd.xlane.f32.xlu0 %v928_v14  ;;  %v817_v19 = vsel %vm540_vm2, %v1501_v18, 0.0 }
 0x414   : > { %712 = vrot.lane.b32.xlu0 %v1654_v24, %s1530_s18 }
 0x41b   : > { %818 = vadd.xlane.f32.xlu1 %v817_v19 }
 0x42c   : > { %823 = vrot.lane.b32.xlu1 %v1654_v24, %s1531_s19 }
 0x430   : > { %934 = vrot.lane.b32.xlu1 %v1654_v24, %s1532_s20 }
 0x46f   : > { %v596_v20 = vpop.xlane.xlu1 %595 }
 0x470   : > { %1502 = vrcp.f32 %v596_v20  ;;  %v1486_v20 = vld [vmem:[%s1787_s9 + $0x8] sm:$0xff]  }
 0x473   : > { %v601_v21 = vpop.permute.xlu1 %600 }
 0x474   : > { %v607_v22 = vsel %vm605_vm3, %v601_v21, 0  ;;  %v1488_v21 = vld [vmem:[%s1789_s11 + $0x18] sm:$0xff]  }
 0x475   : > { %1389 = vmatpush3.bf16.msra.mxu0 %v607_v22  ;;  %v1489_v22 = vld [vmem:[%s1789_s11 + $0x10] sm:$0xff]  }
 0x476   : > { %1400 = vmatprep.subr.bf16.mxu0 %v1520_v8 }
 0x477   : > { %v708_v23 = vpop.xlane.xlu0 %707 }
 0x478   : > { %1504 = vrcp.f32 %v708_v23 }
 0x47d   : > { %v1503_v25 = vpop.eup %1502 }
 0x47e   : > { %v598_v26 = vmul.f32 %v1503_v25, %v1495_v5 }
 0x480   : > { %v599_v27 = vpack.c.bf16 %v598_v26, %v598_v26 }
 0x482   : > { %1391 = vmatmul.mubr.msk.bf16.vlgmr.msra.gmra.mxu0 %vm540_vm2, %v599_v27 }
 0x483   : > { %1402 = vmatprep.mubr.msk.bf16.mxu0 %vm1521_vm1, %v1520_v8 }
 0x485   : > { %v1505_v24 = vpop.eup %1504 }
 0x486   : > { %v710_v29 = vmul.f32 %v1505_v24, %v1497_v10  ;;  %v1330_v24 = vld [vmem:[%s1785_s7] ss:$0 sm:$0xff] }
 0x487   : > { %v930_v28 = vpop.xlane.xlu0 %929 }
 0x488   : > { %v711_v32 = vpack.c.bf16 %v710_v29, %v710_v29  ;;  %v1331_v29 = vld [vmem:[%s1786_s8] ss:$0 sm:$0xff] }
 0x48b   : > { %v713_v30 = vpop.permute.xlu0 %712 }
 0x48c   : > { %v718_v31 = vsel %vm605_vm3, %v713_v30, 0 }
 0x48d   : > { %1401 = vmatpush3.bf16.msra.mxu0 %v718_v31 }
 0x48e   : > { %1412 = vmatprep.subr.bf16.mxu0 %v1520_v8 }
 0x490   : > { %1403 = vmatmul.mubr.msk.bf16.vlgmr.msra.gmra.mxu0 %vm540_vm2, %v711_v32 }
 0x491   : > { %1414 = vmatprep.mubr.msk.bf16.mxu0 %vm1521_vm1, %v1520_v8 }
 0x4a4   : > { %v819_v33 = vpop.xlane.xlu1 %818 }
 0x4a5   : > { %1506 = vrcp.f32 %v819_v33  ;;  %v1490_v33 = vld [vmem:[%s1789_s11 + $0x8] sm:$0xff]  }
 0x4a6   : > { %1508 = vrcp.f32 %v930_v28 }
 0x4a8   : > { %v824_v34 = vpop.permute.xlu1 %823 }
 0x4a9   : > { %v829_v35 = vsel %vm605_vm3, %v824_v34, 0  ;;  %v1491_v34 = vld [vmem:[%s1789_s11] sm:$0xff]  }
 0x4aa   : > { %1413 = vmatpush3.bf16.msra.mxu0 %v829_v35  ;;  %v1332_v35 = vld [vmem:[%s1788_s10] ss:$0 sm:$0xff] }
 0x4ab   : > { %1424 = vmatprep.subr.bf16.mxu0 %v1520_v8 }
 0x4ac   : > { %v935_v38 = vpop.permute.xlu1 %934 }
 0x4ad   : > { %v940_v41 = vsel %vm605_vm3, %v935_v38, 0 }
 0x4b2   : > { %v1507_v36 = vpop.eup %1506 }
 0x4b3   : > { %v821_v37 = vmul.f32 %v1507_v36, %v1501_v18  ;;  %v1509_v40 = vpop.eup %1508 }
 0x4b4   : > { %v932_v42 = vmul.f32 %v1509_v40, %v1499_v13 }
 0x4b5   : > { %v822_v39 = vpack.c.bf16 %v821_v37, %v821_v37 }
 0x4b6   : > { %v933_v43 = vpack.c.bf16 %v932_v42, %v932_v42 }
 0x4b7   : > { %1415 = vmatmul.mubr.msk.bf16.vlgmr.msra.gmra.mxu0 %vm540_vm2, %v822_v39 }
 0x4b8   : > { %1425 = vmatpush3.bf16.msra.mxu0 %v940_v41  ;;  %1426 = vmatprep.mubr.msk.bf16.mxu0 %vm1521_vm1, %v1520_v8 }
 0x4b9   : > { %1438 = vmatprep.subr.bf16.mxu0 %v1520_v8 }
 0x4bf   : > { %1427 = vmatmul.mubr.msk.bf16.vlgmr.msra.gmra.mxu0 %vm540_vm2, %v933_v43  ;;  %v1341_v43 = vld [vmem:[%s1790_s12] ss:$0 sm:$0xff] }
 0x4c0   : > { %1442 = vmatprep.mubr.msk.bf16.mxu0 %vm1521_vm1, %v1520_v8  ;;  %1439 = vmatpush3.bf16.msra.mxu0 %v1486_v20 }
 0x4c1   : > { %1440 = vmatprep.subr.bf16.mxu0 %v1520_v8 }
 0x542   : > { %v643_v44 = vpop.f32.mrf.mxu0 }
 0x544   : > { %v1392_v45 = vpop.f32.mrf.mxu0 }
 0x546   : > { %v646_v46 = vpop.f32.mrf.mxu0 }
 0x548   : > { %v1393_v47 = vpop.f32.mrf.mxu0 }
 0x550   : > { %v754_v48 = vpop.f32.mrf.mxu0 }
 0x551   : > { %983 = vrot.lane.b32.xlu0 %v754_v48, %s1533_s21 }
 0x552   : > { %v1404_v49 = vpop.f32.mrf.mxu0 }
 0x554   : > { %v757_v50 = vpop.f32.mrf.mxu0 }
 0x556   : > { %v1405_v51 = vpop.f32.mrf.mxu0 }
 0x577   : > { %v865_v54 = vpop.f32.mrf.mxu0 }
 0x578   : > { %987 = vrot.lane.b32.xlu1 %v865_v54, %s1534_s29 }
 0x579   : > { %v1416_v55 = vpop.f32.mrf.mxu0 }
 0x57b   : > { %v868_v56 = vpop.f32.mrf.mxu0 }
 0x57d   : > { %v1417_v57 = vpop.f32.mrf.mxu0 }
 0x57f   : > { %v976_v58 = vpop.f32.mrf.mxu0 }
 0x580   : > { %991 = vrot.lane.b32.xlu0 %v976_v58, %s1535_s30 }
 0x581   : > { %v1428_v59 = vpop.f32.mrf.mxu0 }
 0x583   : > { %v979_v60 = vpop.f32.mrf.mxu0 }
 0x585   : > { %v1429_v61 = vpop.f32.mrf.mxu0 }
 0x5c3   : > { %v984_v62 = vpop.permute.xlu0 %983 }
 0x5c4   : > { %v994_v1 = vsel %vm540_vm2, %v643_v44, %v984_v62 }
 0x5ea   : > { %v988_v63 = vpop.permute.xlu1 %987 }
 0x5eb   : > { %v996_v2 = vsel %vm995_vm4, %v994_v1, %v988_v63 }
 0x5f2   : > { %v992_v3 = vpop.permute.xlu0 %991 }
 0x5f3   : > { %v998_v4 = vsel %vm997_vm5, %v996_v2, %v992_v3 }
 0x5f4   : > { %v999_v5 = vpack.c.bf16 %v998_v4, %v998_v4 }
 0x5f6   : > { %1435 = vmatmul.mubr.msk.bf16.vlgmr.msra.gmra.mxu1 %vm440_vm0, %v999_v5 }
 0x5f7   : > { %1454 = vmatprep.mubr.msk.bf16.mxu1 %vm1521_vm1, %v1520_v8  ;;  %1447 = vmatpush3.bf16.msra.mxu1 %v1488_v21 }
 0x5f8   : > { %1448 = vmatprep.subr.bf16.mxu1 %v1520_v8 }
 0x5fb   : > { %1449 = vmatpush3.bf16.msra.mxu1 %v1489_v22 }
 0x5fc   : > { %1450 = vmatprep.subr.bf16.mxu1 %v1520_v8 }
 0x5ff   : > { %1451 = vmatpush3.bf16.msra.mxu1 %v1490_v33 }
 0x600   : > { %1452 = vmatprep.subr.bf16.mxu1 %v1520_v8 }
 0x603   : > { %1453 = vmatpush3.bf16.msra.mxu1 %v1491_v34 }
 0x6b6   : > { %v1053_v6 = vpop.f32.mrf.mxu1 }
 0x6b7   : > { %v1059_v9 = vadd.f32 %v1053_v6, %v1622_v0  ;;  %v1487_v0 = vld [vmem:[%s1787_s9] sm:$0xff]  }
 0x6b8   : > { %v1436_v10 = vpop.f32.mrf.mxu1  ;;  %1441 = vmatpush3.bf16.msra.mxu0 %v1487_v0 }
 0x6b9   : > { %v1067_v11 = vadd.f32 %v1329_v7, %v1059_v9 }
 0x6ba   : > { %v1056_v12 = vpop.f32.mrf.mxu1 }
 0x6bb   : > { %v1070_v13 = vsel %vm440_vm0, %v1067_v11, 0.0 }
 0x6bc   : > { %1071 = vadd.xlane.f32.xlu1 %v1070_v13  ;;  %v1437_v14 = vpop.f32.mrf.mxu1 }
 0x745   : > { %v1072_v15 = vpop.xlane.xlu1 %1071 }
 0x746   : > { %v1073_v16 = vmul.f32 0.03125, %v1072_v15 }
 0x748   : > { %v1074_v17 = vsub.f32 %v1067_v11, %v1073_v16 }
 0x74a   : > { %v1075_v18 = vmul.f32 %v1074_v17, %v1074_v17 }
 0x74c   : > { %v1076_v19 = vsel %vm440_vm0, %v1075_v18, 0.0 }
 0x74d   : > { %1077 = vadd.xlane.f32.xlu0 %v1076_v19 }
 0x7d6   : > { %v1078_v23 = vpop.xlane.xlu0 %1077 }
 0x7d7   : > { %v1079_v25 = vmul.f32 0.03125, %v1078_v23 }
 0x7d9   : > { %v1080_v26 = vadd.f32 1e-05, %v1079_v25 }
 0x7db   : > { %1510 = vrsqrt.f32 %v1080_v26 }
 0x7e8   : > { %v1511_v27 = vpop.eup %1510 }
 0x7e9   : > { %v1082_v28 = vmul.f32 %v1511_v27, %v1074_v17 }
 0x7eb   : > { %v1089_v30 = vmul.f32 %v1330_v24, %v1082_v28 }
 0x7ed   : > { %v1096_v31 = vadd.f32 %v1331_v29, %v1089_v30 }
 0x7ef   : > { %v1097_v32 = vpack.c.bf16 %v1096_v31, %v1096_v31 }
 0x7f1   : > { %1443 = vmatmul.mubr.msk.bf16.vlgmr.msra.gmra.mxu0 %vm440_vm0, %v1097_v32 }
 0x8b1   : > { %v1158_v36 = vpop.f32.mrf.mxu0 }
 0x8b2   : > { %v1159_v37 = vadd.f32 %v1332_v35, %v1158_v36 }
 0x8b3   : > { %v1444_v38 = vpop.f32.mrf.mxu0 }
 0x8b4   : > { %v1164_v39 = vmax.f32 %v1159_v37, 0.0 }
 0x8b5   : > { %v1161_v40 = vpop.f32.mrf.mxu0 }
 0x8b6   : > { %v1165_v41 = vpack.c.bf16 %v1164_v39, %v1164_v39 }
 0x8b7   : > { %v1445_v42 = vpop.f32.mrf.mxu0 }
 0x8b8   : > { %1455 = vmatmul.mubr.msk.bf16.vlgmr.msra.gmra.mxu1 %vm1198_vm6, %v1165_v41 }
 0x978   : > { %v1236_v8 = vpop.f32.mrf.mxu1 }
 0x979   : > { %v1242_v44 = vadd.f32 %v1236_v8, %v1067_v11 }
 0x97a   : > { %v1456_v45 = vpop.f32.mrf.mxu1 }
 0x97b   : > { %v1250_v46 = vadd.f32 %v1341_v43, %v1242_v44 }
 0x97c   : > { %v1239_v47 = vpop.f32.mrf.mxu1 }
 0x97d   : > { %1251 = vst.msk [vmem:[%s435_s24] sm:$0xff] %vm440_vm0, %v1250_v46 }
 0x97e   : > { %v1457_v48 = vpop.f32.mrf.mxu1 }
 0x97f PF: > { %s23_s25 = sadd.s32 1, %s1518_s25  }
 0x980   : > { %p20_p4 = scmp.ge.s32.totalorder %s23_s25, 4  }
 0x982   :  { %22 = sbr.rel (!%p20_p4) target bundleno = 1 (0x1), region = 102 }

</bundles_post_ra>
